<compile_context>
chip_gen: v6e
topology: v6e:2x2x1
jax: 0.10.0
libtpu: 0.0.40
codegen_flags: <defaults>
</compile_context>

<pallas_src>
import functools

import jax
import jax.numpy as jnp
from jax.experimental import pallas as pl
from jax.experimental.pallas import tpu as pltpu


def _round_up(x: int, m: int) -> int:
    return ((x + m - 1) // m) * m


def _gaussian_kernel_body(x_ref, mean_dm_ref, mu_sq_ref, o_ref, x_sq_ref, *, beta):
    # x_ref:       (1, tn, D)   one (batch, N-tile) slab of X
    # mean_dm_ref: (D, tm)      pre-transposed means tile
    # mu_sq_ref:   (1, tm)      precomputed ||mu||^2 row for this M tile
    # o_ref:       (1, tn, tm)  output tile
    # x_sq_ref:    (tn, 1)      f32 VMEM scratch: ||x||^2 per row, reused across M tiles

    # ||x||^2 only needs to be computed on the first M tile of each (b, n) point.
    @pl.when(pl.program_id(2) == 0)
    def _():
        xf = x_ref[0].astype(jnp.float32)
        x_sq_ref[...] = jnp.sum(xf * xf, axis=-1, keepdims=True)

    # -2 * x @ mu on the MXU, accumulating in f32.
    xmu = jnp.dot(x_ref[0], mean_dm_ref[...],
                  preferred_element_type=jnp.float32)            # (tn, tm)

    sq = x_sq_ref[...] + mu_sq_ref[...] - 2.0 * xmu              # (tn, tm)
    sq = jnp.maximum(sq, 0.0)   # cdist**2 >= 0; guards expansion round-off
    o_ref[0] = jnp.exp(sq * (-beta)).astype(o_ref.dtype)         # exp on the EUP


def gaussian_kernel_forward(X, mean, sigma: float = 1.0, *,
                            tn_target: int = 256, tm_target: int = 512,
                            matmul_dtype=None):
    """X: (B, N, D); mean: (M, D) -> (B, N, M) float32.

    matmul_dtype: optional (e.g. jnp.bfloat16 on v6e/v7x) dtype for the MXU inputs;
    default keeps the input dtype (float32) for tight numerics.
    """
    B, N, D = X.shape
    M, D2 = mean.shape
    assert D == D2, "feature dims must match"
    beta = 1.0 / (2.0 * float(sigma) ** 2)   # Python float -> literal in the kernel

    # ---- tile sizes & padding: N -> multiple of 8, M -> multiple of 128 ----
    n8 = _round_up(N, 8)
    if n8 <= tn_target:
        tn, n_pad = n8, n8
    else:
        tn, n_pad = tn_target, _round_up(N, tn_target)
    m128 = _round_up(M, 128)
    if m128 <= tm_target:
        tm, m_pad = m128, m128
    else:
        tm, m_pad = tm_target, _round_up(M, tm_target)

    # ---- wrapper-side precompute (layout plumbing + tiny reductions) ----
    mean_f32 = mean.astype(jnp.float32)
    mu_sq = jnp.sum(mean_f32 * mean_f32, axis=-1)                 # (M,)
    mu_sq = jnp.pad(mu_sq, (0, m_pad - M))[None, :]               # (1, M_pad) f32

    in_dtype = jnp.dtype(matmul_dtype) if matmul_dtype is not None else X.dtype
    X_p = X
    if n_pad != N:
        X_p = jnp.pad(X_p, ((0, 0), (0, n_pad - N), (0, 0)))
    X_p = X_p.astype(in_dtype)

    mean_p = mean
    if m_pad != M:
        mean_p = jnp.pad(mean_p, ((0, m_pad - M), (0, 0)))
    mean_dm = jnp.transpose(mean_p.astype(in_dtype))              # (D, M_pad)

    grid = (B, n_pad // tn, m_pad // tm)

    # ---- VMEM budget: double-buffered inputs/outputs + scratch, capped at 48 MiB
    # (safe on v7x's 64 MiB physical VMEM, above the 16/32 MiB scoped defaults). ----
    in_bytes = jnp.dtype(in_dtype).itemsize
    need = 2 * ((tn * D + D * tm) * in_bytes + (tm + tn * tm) * 4) + tn * 4
    vmem_limit = int(min(max(need + (8 << 20), 32 << 20), 48 << 20))

    cost = pl.CostEstimate(
        flops=2 * B * n_pad * m_pad * D,
        transcendentals=B * n_pad * m_pad,
        bytes_accessed=(B * n_pad * D * in_bytes + D * m_pad * in_bytes
                        + m_pad * 4 + B * n_pad * m_pad * 4),
    )

    kernel = functools.partial(_gaussian_kernel_body, beta=beta)

    out_p = pl.pallas_call(
        kernel,
        out_shape=jax.ShapeDtypeStruct((B, n_pad, m_pad), jnp.float32),
        grid_spec=pltpu.PrefetchScalarGridSpec(
            num_scalar_prefetch=0,
            grid=grid,
            in_specs=[
                pl.BlockSpec((1, tn, D), lambda b, n, m: (b, n, 0)),   # X tile
                pl.BlockSpec((D, tm), lambda b, n, m: (0, m)),         # mean^T tile
                pl.BlockSpec((1, tm), lambda b, n, m: (0, m)),         # ||mu||^2 tile
            ],
            out_specs=pl.BlockSpec((1, tn, tm), lambda b, n, m: (b, n, m)),
            scratch_shapes=[pltpu.VMEM((tn, 1), jnp.float32)],         # ||x||^2 cache
        ),
        compiler_params=pltpu.CompilerParams(
            dimension_semantics=("parallel", "parallel", "arbitrary"),
            vmem_limit_bytes=vmem_limit,
        ),
        cost_estimate=cost,
    )(X_p, mean_dm, mu_sq)

    return out_p[:, :N, :M]


def gaussian_kernel_reference(X, mean, sigma: float = 1.0):
    """Pure-JAX reference matching torch.cdist(..)**2 -> exp(-beta * .)."""
    beta = 1.0 / (2.0 * sigma ** 2)
    diff = X[:, :, None, :] - mean[None, None, :, :]      # (B, N, M, D)
    sq = jnp.sum(diff * diff, axis=-1)                    # (B, N, M)
    return jnp.exp(-beta * sq)


# TODO(synk): GaussianKernel.init (random-permutation / random-projection buffer
# re-initialization) is host-side state management, not a forward kernel; not ported.

if __name__ == "__main__":
    key = jax.random.PRNGKey(0)
    k1, k2 = jax.random.split(key)

    B, N, D, M = 2, 16, 32, 8
    X = jax.random.normal(k1, (B, N, D), dtype=jnp.float32)
    mean = jax.random.normal(k2, (M, D), dtype=jnp.float32)  # the registered buffer
    sigma = 1.0

    out = gaussian_kernel_forward(X, mean, sigma)
    out = jax.block_until_ready(out)

    ref = gaussian_kernel_reference(X, mean, sigma)
    assert out.shape == (B, N, M)
    assert jnp.allclose(out, ref, atol=2e-5, rtol=2e-5), "mismatch vs reference"

    print("KERNEL_OK")
</pallas_src>

<mosaic_0001>
module attributes {stable_mosaic.version = 11 : i64} {
  func.func @_gaussian_kernel_body(%arg0: i32, %arg1: i32, %arg2: i32, %arg3: memref<1x16x32xf32, #tpu.memory_space<vmem>>, %arg4: memref<32x128xf32, #tpu.memory_space<vmem>>, %arg5: memref<1x128xf32, #tpu.memory_space<vmem>>, %arg6: memref<1x16x128xf32, #tpu.memory_space<vmem>>, %arg7: memref<16x1xf32, #tpu.memory_space<vmem>>) attributes {dimension_semantics = [#tpu.dimension_semantics<parallel>, #tpu.dimension_semantics<parallel>, #tpu.dimension_semantics<arbitrary>], iteration_bounds = array<i64: 2, 1, 1>, scalar_prefetch = 0 : i64, scratch_operands = 1 : i64, tpu.core_type = #tpu.core_type<tc>, window_params = [{transform_indices = @transform_0, window_bounds = array<i64: 1, 16, 32>}, {transform_indices = @transform_1, window_bounds = array<i64: 32, 128>}, {transform_indices = @transform_2, window_bounds = array<i64: 1, 128>}, {transform_indices = @transform_3, window_bounds = array<i64: 1, 16, 128>}]} {
    %c0_i32 = arith.constant 0 : i32
    %0 = arith.cmpi eq, %arg2, %c0_i32 : i32
    %1 = arith.extui %0 : i1 to i32
    %c0_i32_0 = arith.constant 0 : i32
    %2 = arith.cmpi ne, %1, %c0_i32_0 : i32
    scf.if %2 {
      %c0_15 = arith.constant 0 : index
      %c0_16 = arith.constant 0 : index
      %c0_17 = arith.constant 0 : index
      %23 = vector.load %arg3[%c0_15, %c0_16, %c0_17] : memref<1x16x32xf32, #tpu.memory_space<vmem>>, vector<1x16x32xf32>
      %24 = vector.shape_cast %23 : vector<1x16x32xf32> to vector<16x32xf32>
      %25 = arith.mulf %24, %24 : vector<16x32xf32>
      %cst_18 = arith.constant dense<0.000000e+00> : vector<16xf32>
      %26 = vector.multi_reduction <add>, %25, %cst_18 [1] : vector<16x32xf32> to vector<16xf32>
      %27 = vector.shape_cast %26 : vector<16xf32> to vector<16x1xf32>
      %c0_19 = arith.constant 0 : index
      %c0_20 = arith.constant 0 : index
      %28 = vector.load %arg7[%c0_19, %c0_20] : memref<16x1xf32, #tpu.memory_space<vmem>>, vector<16x1xf32>
      tpu.vector_store %arg7[%c0_19, %c0_20], %27 {strides = array<i32>} : memref<16x1xf32, #tpu.memory_space<vmem>>, vector<16x1xf32>,
    } else {
    }
    %c0 = arith.constant 0 : index
    %c0_1 = arith.constant 0 : index
    %c0_2 = arith.constant 0 : index
    %3 = vector.load %arg3[%c0, %c0_1, %c0_2] : memref<1x16x32xf32, #tpu.memory_space<vmem>>, vector<1x16x32xf32>
    %4 = vector.shape_cast %3 : vector<1x16x32xf32> to vector<16x32xf32>
    %c0_3 = arith.constant 0 : index
    %c0_4 = arith.constant 0 : index
    %5 = vector.load %arg4[%c0_3, %c0_4] : memref<32x128xf32, #tpu.memory_space<vmem>>, vector<32x128xf32>
    %cst = arith.constant dense<0.000000e+00> : vector<16x128xf32>
    %6 = tpu.matmul %4, %5, %cst {dimension_numbers = #tpu.dot_dimension_numbers<[1], [0], [0], [1], [0, 0, 1, 1], [], []>} : vector<16x32xf32>, vector<32x128xf32>, vector<16x128xf32> -> vector<16x128xf32>
    %c0_5 = arith.constant 0 : index
    %c0_6 = arith.constant 0 : index
    %7 = vector.load %arg7[%c0_5, %c0_6] : memref<16x1xf32, #tpu.memory_space<vmem>>, vector<16x1xf32>
    %c0_7 = arith.constant 0 : index
    %c0_8 = arith.constant 0 : index
    %8 = vector.load %arg5[%c0_7, %c0_8] : memref<1x128xf32, #tpu.memory_space<vmem>>, vector<1x128xf32>
    %9 = vector.broadcast %7 : vector<16x1xf32> to vector<16x128xf32>
    %10 = vector.broadcast %8 : vector<1x128xf32> to vector<16x128xf32>
    %11 = arith.addf %9, %10 : vector<16x128xf32>
    %cst_9 = arith.constant 2.000000e+00 : f32
    %12 = vector.broadcast %cst_9 : f32 to vector<16x128xf32>
    %13 = arith.mulf %12, %6 : vector<16x128xf32>
    %14 = arith.subf %11, %13 : vector<16x128xf32>
    %cst_10 = arith.constant 0.000000e+00 : f32
    %15 = vector.broadcast %cst_10 : f32 to vector<16x128xf32>
    %16 = arith.maximumf %14, %15 : vector<16x128xf32>
    %cst_11 = arith.constant -5.000000e-01 : f32
    %17 = vector.broadcast %cst_11 : f32 to vector<16x128xf32>
    %18 = arith.mulf %16, %17 : vector<16x128xf32>
    %19 = math.exp %18 : vector<16x128xf32>
    %c0_12 = arith.constant 0 : index
    %c0_13 = arith.constant 0 : index
    %c0_14 = arith.constant 0 : index
    %20 = vector.load %arg6[%c0_12, %c0_13, %c0_14] : memref<1x16x128xf32, #tpu.memory_space<vmem>>, vector<1x16x128xf32>
    %21 = vector.shape_cast %20 : vector<1x16x128xf32> to vector<16x128xf32>
    %22 = vector.shape_cast %19 : vector<16x128xf32> to vector<1x16x128xf32>
    tpu.vector_store %arg6[%c0_12, %c0_13, %c0_14], %22 {strides = array<i32>} : memref<1x16x128xf32, #tpu.memory_space<vmem>>, vector<1x16x128xf32>,
    return
  }
  func.func @transform_0(%arg0: i32, %arg1: i32, %arg2: i32) -> (i32, i32, i32) {
    %c0_i32 = arith.constant 0 : i32
    %c0_i32_0 = arith.constant 0 : i32
    return %arg0, %arg1, %c0_i32 : i32, i32, i32
  }
  func.func @transform_1(%arg0: i32, %arg1: i32, %arg2: i32) -> (i32, i32) {
    %c0_i32 = arith.constant 0 : i32
    %c0_i32_0 = arith.constant 0 : i32
    return %c0_i32, %arg2 : i32, i32
  }
  func.func @transform_2(%arg0: i32, %arg1: i32, %arg2: i32) -> (i32, i32) {
    %c0_i32 = arith.constant 0 : i32
    %c0_i32_0 = arith.constant 0 : i32
    return %c0_i32, %arg2 : i32, i32
  }
  func.func @transform_3(%arg0: i32, %arg1: i32, %arg2: i32) -> (i32, i32, i32) {
    %c0_i32 = arith.constant 0 : i32
    return %arg0, %arg1, %arg2 : i32, i32, i32
  }
}

</mosaic_0001>

<bundles_post_ra>
// kernel: tpu_custom_call.1
= control target key start
LH: loop header
LB: loop body
LE: loop exit
PB: predicated region body
PF: predicated region fallthrough
CT: control target
= control target key end

     0   :  { %8 = vsyncpa [#allocation4], 0  ;;  %s1017_s0 = inlined_call_operand.hbm [shape: f32[2,16,32], index: 0, kind: input, shape index: {}]   ;;  %s1018_s1 = inlined_call_operand.hbm [shape: f32[32,128], index: 1, kind: input, shape index: {}]   ;;  %s1019_s2 = inlined_call_operand.vmem [shape: f32[1,128], index: 2, kind: input, shape index: {}]   ;;  %s1020_s3 = inlined_call_operand.hbm [shape: f32[2,16,128], index: 3, kind: output, shape index: {}]  }
   0x1   :  { %10 = vsyncpa [#allocation4 + $0x1], 0 }
   0x2   :  { %11 = vsyncpa [#allocation7], 0 }
   0x3   :  { %12 = vsyncpa [#allocation5], 0 }
   0x4   :  { %14 = vsyncpa [#allocation5 + $0x1], 0  ;;  %s819_s12 = smov 0   ;;  %s821_s13 = smov 0  }
   0x5   :  { %s823_s14 = smov 0   ;;  %s825_s15 = smov 0  }
   0x6   :  { %s827_s16 = smov 0   ;;  %s829_s17 = smov 0  }
   0x7 LB: > { %s527_s18 = sadd.s32 4294967295, %s789_s17   ;;  %s528_s19 = sadd.s32 4294967294, %s789_s17   ;;  %s789_s17 = sphi %s829_s17, %s20_s17   ;;  %s785_s16 = sphi %s827_s16, %s1042_s16   ;;  %s781_s15 = sphi %s825_s15, %s1041_s15   ;;  %s777_s14 = sphi %s823_s14, %s1040_s14   ;;  %s773_s13 = sphi %s821_s13, %s1039_s13   ;;  %s769_s12 = sphi %s819_s12, %s1038_s12  }
   0x8   : > { %p61_p0 = scmp.ne.s32.totalorder %s773_s13, %s769_s12  ;;  %p853_p1 = scmp.eq.s32.totalorder %s527_s18, 0 }
   0x9   : > { %p857_p2 = scmp.eq.s32.totalorder %s527_s18, 1  ;;  %p147_p3 = scmp.eq.s32.totalorder %s528_s19, 1 }
   0xa   : > { %p863_p4 = por %p853_p1, %p61_p0  ;;  %p529_p5 = scmp.ge.s32.totalorder %s789_s17, 1 }
   0xb   : > { %p868_p6 = por %p147_p3, %p61_p0  ;;  %p154_p7 = scmp.lt.s32.totalorder %s789_s17, 3 }
   0xc   : > { %s1026_s22 = scalar_select %p863_p4, 1, 0 }
   0xd   : > { %s1027_s23 = scalar_select %p868_p6, 1, 0 }
   0xe   : > { %p873_p8 = pnand %p529_p5, %p154_p7  ;;  %s791_s25 = smov [#allocation6]  }
   0xf   : > { %s168_s26 = sshll.u32 %s791_s25, 4  ;;  %s39_s28 = sadd.s32 1, %s785_s16  ;;  %s169_s26 = int_to_ptr.vmem [resolvable:$true] %s168_s26 }
  0x10   : > { %p575_p9 = pneg %p873_p8  ;;  %s662_s29 = scalar_lea.vmem %s169_s26, 512 }
  0x11   : > { %p663_p13 = scmp.ne.s32.totalorder %s169_s26, %s662_s29  ;;  %p670_p5 = scmp.lt.s32.totalorder %s169_s26, %s169_s26 }
  0x12   : > { %p882_p11 = pnand %p575_p9, %p853_p1  ;;  %p671_p7 = scmp.lt.s32.totalorder %s662_s29, %s662_s29 }
  0x14   : > { %p653_p12 = pneg %p882_p11  ;;  %p672_p6 = por %p671_p7, %p670_p5 }
  0x16   : > { %p665_p0 = pnand %p663_p13, %p653_p12 }
  0x18   : > { %p666_p3 = pneg %p665_p0 }
  0x1a   : > { %p673_p4 = pnand %p672_p6, %p666_p3 }
  0x1c   : > { %676 = shalt.err (!%p673_p4)
}
  0x1d   : > { %s1022_s30 = smov 128   ;;  %s1023_s4 = smov 8  }
  0x1e   : > { %578 = dma.hbm_to_vmem [thread:$0]  (!%p882_p11), %s1018_s1, 512, %s169_s26, [#allocation7], %s1022_s30, %s1022_s30, %s1023_s4  }
  0x1f   : > { %p41_p4 = scmp.ge.s32.totalorder %s39_s28, 2  ;;  %s48_s7 = sadd.s32 1, %s777_s14 }
  0x20   : > { %p55_p6 = scmp.ne.s32.totalorder %s777_s14, %s773_s13  ;;  %p56_p9 = scmp.eq.s32.totalorder %s789_s17, 0 }
  0x21   : > { %s1044_s28 = smov (%p41_p4, %s39_s28), 0  ;;  %p588_p0 = scmp.lt.s32.totalorder %s789_s17, 2 }
  0x22   : > { %p903_p12 = por %p56_p9, %p55_p6  ;;  %p909_p13 = por %p857_p2, %p55_p6 }
  0x23   : > { %s43_s10 = ssub.s32 %s785_s16, %s1044_s28  ;;  %s188_s11 = sand.u32 1, %s777_s14  }
  0x24   : > { %p46_p11 = scmp.eq.s32.totalorder %s43_s10, 0  ;;  %s533_s18 = sshll.u32 %s188_s11, 4 }
  0x25   : > { %s548_s25 = sshll.u32 %s785_s16, 8  ;;  %s192_s5 = scalar_lea.vmem [#allocation3], %s533_s18 }
  0x26   : > { %s918_s19 = scalar_select %p46_p11, %s777_s14, %s48_s7  }
  0x27   : > { %s200_s29 = scalar_lea.hbm %s1017_s0, %s548_s25  ;;  %s201_s6 = sshll.u32 %s192_s5, 4  ;;  %s202_s6 = int_to_ptr.vmem [resolvable:$true] %s201_s6 }
  0x28   : > { %p926_p2 = pnand %p588_p0, %p903_p12  ;;  %s189_s30 = scalar_lea.sflag [#allocation4], %s188_s11 }
  0x29   : > { %s690_s10 = scalar_lea.vmem %s202_s6, 256  ;;  %s794_s7 = smov [#allocation3]  }
  0x2a   : > { %p679_p3 = pneg %p926_p2  ;;  %p691_p5 = scmp.ne.s32.totalorder %s202_s6, %s690_s10 }
  0x2b   : > { %s695_s4 = sshll.u32 %s794_s7, 4  ;;  %s696_s4 = int_to_ptr.vmem [resolvable:$false] %s695_s4 }
  0x2c   : > { %p693_p7 = pnand %p691_p5, %p679_p3  ;;  %s697_s25 = scalar_lea.vmem %s696_s4, 512 }
  0x2d   : > { %p698_p6 = scmp.lt.s32.totalorder %s202_s6, %s696_s4  ;;  %p699_p9 = scmp.lt.s32.totalorder %s697_s25, %s690_s10 }
  0x2e   : > { %p694_p4 = pneg %p693_p7 }
  0x2f   : > { %p700_p11 = por %p699_p9, %p698_p6 }
  0x31   : > { %p701_p10 = pnand %p700_p11, %p694_p4 }
  0x33   : > { %704 = shalt.err (!%p701_p10)
}
  0x34   : > { %s1033_s8 = smov 8   ;;  %s1034_s18 = smov 128  }
  0x35   : > { %582 = dma.hbm_to_vmem [thread:$0]  (!%p926_p2), %s200_s29, 256, %s202_s6, %s189_s30, %s1034_s18, %s1034_s18, %s1033_s8  }
  0x36   : > { %213 = sbr.rel (%p873_p8) target bundleno = 378 (0x17a), region = 32  ;;  %s940_s11 = sand.u32 (!%p873_p8), 1, %s773_s13  }
  0x37   : > { %s537_s4 = sshll.u32 (!%p873_p8), %s940_s11, 4  ;;  %s216_s26 = scalar_lea.sflag (!%p873_p8), [#allocation4], %s940_s11 }
  0x38   : > { %s219_s27 = scalar_lea.vmem (!%p873_p8), [#allocation3], %s537_s4  ;;  %p1035_p10 = scmp.ne.s32.totalorder (!%p873_p8), %s1026_s22, 0 }
  0x3b   : > { %756 = dma.done.wait (%p1035_p10), %s216_s26, 256  }
  0x3c   : > { %758 = vsyncadd (%p1035_p10), %s216_s26, 4294967040 }
  0x3d   : > { %760 = dma.done.wait (%p853_p1), [#allocation7], 512  }
  0x3e   : > { %762 = vsyncadd (%p853_p1), [#allocation7], 4294966784  ;;  %v258_v0 = vld [vmem:[%s219_s27] sm:$0xff]  ;;  %vm262_vm0 = vcmask 261120   ;;  %v259_v1 = vld [vmem:[%s219_s27 + $0x8] sm:$0xff]  ;;  %v795_v10 = vmov 0  }
  0x3f   : > { %v277_v2 = vld [vmem:[#allocation6 + $0x18] sm:$0xff]  ;;  %v260_v3 = vmul.f32 %v258_v0, %v258_v0  ;;  %v261_v4 = vmul.f32 %v259_v1, %v259_v1  ;;  %v276_v5 = vld [vmem:[#allocation6 + $0x10] sm:$0xff]  ;;  %564 = vmatprep.mubr.msk.f32.mxu0 %vm262_vm0, %v258_v0  ;;  %v275_v6 = vld [vmem:[#allocation6 + $0x8] sm:$0xff]  ;;  %645 = vset.pattern.permute.xlu1 %v795_v10  ;;  %vm269_vm1 = vcmask 7168   ;;  %s549_s24 = sshll.u32 %s781_s15, 8  ;;  %s248_s30 = scalar_lea.vmem [#allocation8], %s537_s4 }
  0x40   : > { %556 = vmatprep.subr.mxu0 %v277_v2  ;;  %v274_v8 = vld [vmem:[#allocation6] sm:$0xff]  ;;  %646 = vset.pattern.permute.xlu0 %v795_v10  ;;  %v542_v17 = vld [vmem:[%s1019_s2] ss:$0 sm:$0xff]  ;;  %s412_s29 = sshll.u32 %s248_s30, 4  ;;  %s967_s21 = scalar_lea.hbm %s1020_s3, %s549_s24  ;;  %s969_s29 = int_to_ptr.vmem [resolvable:$true] %s412_s29 }
  0x41   : > { %557 = vmatpush3.msra.mxu0 %v277_v2  ;;  %v263_v7 = vsel %vm262_vm0, %v260_v3, 0.0  ;;  %v266_v9 = vsel %vm262_vm0, %v261_v4, 0.0  ;;  %s396_s10 = scalar_lea.sflag [#allocation5], %s940_s11  ;;  %s705_s7 = scalar_lea.vmem %s969_s29, 256 }
  0x42   : > { %558 = vmatprep.subr.mxu0 %v276_v5  ;;  %264 = vadd.xlane.f32.xlu0 %v263_v7  ;;  %p706_p1 = scmp.ne.s32.totalorder %s969_s29, %s705_s7  ;;  %s796_s15 = smov [#allocation8]  }
  0x43   : > { %559 = vmatpush3.msra.mxu0 %v276_v5  ;;  %s709_s25 = sshll.u32 %s796_s15, 4  ;;  %s710_s25 = int_to_ptr.vmem [resolvable:$false] %s709_s25 }
  0x44   : > { %560 = vmatprep.subr.mxu0 %v275_v6  ;;  %p707_p8 = pnand %p706_p1, %p909_p13  ;;  %s711_s8 = scalar_lea.vmem %s710_s25, 512 }
  0x45   : > { %561 = vmatpush3.msra.mxu0 %v275_v6  ;;  %p712_p0 = scmp.lt.s32.totalorder %s969_s29, %s710_s25  ;;  %p713_p2 = scmp.lt.s32.totalorder %s711_s8, %s705_s7 }
  0x46   : > { %562 = vmatprep.subr.mxu0 %v274_v8  ;;  %267 = vadd.xlane.f32.xlu0 %v266_v9  ;;  %p708_p12 = pneg %p707_p8 }
  0x47   : > { %563 = vmatpush3.msra.mxu0 %v274_v8  ;;  %p714_p3 = por %p713_p2, %p712_p0 }
  0x48   : > { %565 = vmatmul.mubr.msk.f32.vlgmr.msra.gmra.mxu0 %vm262_vm0, %v259_v1 }
  0x49   : > { %p715_p5 = pnand %p714_p3, %p708_p12 }
  0xcb   : > { %v265_v11 = vpop.xlane.xlu0 %264 }
  0xcc   : > { %270 = vst.msk [vmem:[#allocation2] sm:$0xff] %vm269_vm1, %v265_v11 }
  0xcf   : > { %v268_v12 = vpop.xlane.xlu0 %267 }
  0xd0   : > { %271 = vst.msk [vmem:[#allocation2 + $0x8] sm:$0xff] %vm269_vm1, %v268_v12 }
  0xd3   : > { %v360_v13 = vld [vmem:[#allocation2] sm:$0xff] }
  0xd4   : > { %365 = vperm.xlu1 %645, %v360_v13  }
  0xd7   : > { %v361_v14 = vld [vmem:[#allocation2 + $0x8] sm:$0xff] }
  0xd8   : > { %370 = vperm.xlu1 %645, %v361_v14  }
 0x108   : > { %v566_v15 = vpop.f32.mrf.mxu0 }
 0x109   : > { %v382_v23 = vmul.f32 2.0, %v566_v15 }
 0x10a   : > { %v351_v16 = vpop.f32.mrf.mxu0 }
 0x10b   : > { %v381_v18 = vmul.f32 2.0, %v351_v16 }
 0x14f   : > { %v366_v19 = vpop.permute.xlu1 %365 }
 0x150   : > { %v379_v20 = vadd.f32 %v542_v17, %v366_v19 }
 0x152   : > { %v383_v21 = vsub.f32 %v379_v20, %v381_v18 }
 0x153   : > { %v371_v22 = vpop.permute.xlu1 %370 }
 0x154   : > { %v385_v24 = vmax.f32 %v383_v21, 0.0  ;;  %v380_v25 = vadd.f32 %v542_v17, %v371_v22 }
 0x156   : > { %v387_v26 = vmul.f32 -0.5, %v385_v24  ;;  %v384_v27 = vsub.f32 %v380_v25, %v382_v23 }
 0x158   : > { %v389_v28 = vmul.f32 1.442695, %v387_v26  ;;  %v386_v29 = vmax.f32 %v384_v27, 0.0 }
 0x15a   : > { %647 = vpow2.f32 %v389_v28  ;;  %v388_v30 = vmul.f32 -0.5, %v386_v29 }
 0x15c   : > { %v391_v31 = vmul.f32 1.442695, %v388_v30 }
 0x15e   : > { %649 = vpow2.f32 %v391_v31 }
 0x167   : > { %v648_v32 = vpop.eup %647 }
 0x168   : > { %393 = vst [vmem:[%s248_s30] sm:$0xff] %v648_v32 }
 0x16b   : > { %v650_v33 = vpop.eup %649 }
 0x16c   : > { %394 = vst [vmem:[%s248_s30 + $0x8] sm:$0xff] %v650_v33 }
 0x16d   : > { %718 = shalt.err (!%p715_p5)
}
 0x16e   : > { %s719_s18 = scalar_lea.hbm %s967_s21, 256  ;;  %s723_s27 = scalar_lea.hbm %s1020_s3, 512 }
 0x16f   : > { %p720_p7 = scmp.ne.s32.totalorder %s967_s21, %s719_s18  ;;  %p724_p9 = scmp.lt.s32.totalorder %s967_s21, %s1020_s3 }
 0x170   : > { %p725_p11 = scmp.lt.s32.totalorder %s723_s27, %s719_s18 }
 0x171   : > { %p721_p4 = pnand %p720_p7, %p909_p13 }
 0x172   : > { %p726_p10 = por %p725_p11, %p724_p9 }
 0x173   : > { %p722_p6 = pneg %p721_p4 }
 0x175   : > { %p727_p1 = pnand %p726_p10, %p722_p6 }
 0x177   : > { %730 = shalt.err (!%p727_p1)
}
 0x178   : > { %s797_s24 = smov 128   ;;  %s798_s30 = smov 8  }
 0x179   : > { %573 = dma.vmem_to_hbm [thread:$0]  (%p909_p13), %s969_s29, 256, %s967_s21, %s396_s10, %s797_s24, %s797_s24, %s798_s30  }
 0x17a PF: > { %s427_s5 = sand.u32 1, %s769_s12   ;;  %p1036_p8 = scmp.ne.s32.totalorder %s1027_s23, 0 }
 0x17b   : > { %p1037_p12 = scmp.ge.s32.totalorder %s789_s17, 2  ;;  %s428_s6 = scalar_lea.sflag [#allocation5], %s427_s5 }
 0x17d   : > { %p584_p0 = pnand %p1037_p12, %p1036_p8 }
 0x17f   : > { %p585_p2 = pneg %p584_p0 }
 0x181   : > { %764 = dma.done.wait (%p585_p2), %s428_s6, 256  }
 0x182   : > { %766 = vsyncadd (%p585_p2), %s428_s6, 4294967040  ;;  %s20_s17 = sadd.s32 1, %s789_s17   ;;  %s1038_s12 = smov %s773_s13 }
 0x183   : > { %p17_p3 = scmp.ge.s32.totalorder %s20_s17, 4   ;;  %s1039_s13 = smov %s777_s14 }
 0x184   : > { %s1040_s14 = smov %s918_s19  ;;  %s1041_s15 = smov %s785_s16 }
 0x185   : > { %s1042_s16 = smov %s1044_s28  ;;  %19 = sbr.rel (!%p17_p3) target bundleno = 7 (0x7), region = 89 }
 0x18a   :  { %433 = vsyncpa [#allocation4], 1 }
 0x18b   :  { %435 = vsyncpa [#allocation4 + $0x1], 1 }
 0x18c   :  { %436 = vsyncpa [#allocation7], 1 }
 0x18d   :  { %437 = vsyncpa [#allocation5], 1 }
 0x18e   :  { %439 = vsyncpa [#allocation5 + $0x1], 1 }

</bundles_post_ra>
